<compile_context>
chip_gen: v6e
topology: v6e:2x2x1
jax: 0.10.0
libtpu: 0.0.40
codegen_flags: <defaults>
</compile_context>

<pallas_src>
import functools

import jax
import jax.numpy as jnp
from jax import lax
from jax.experimental import pallas as pl
from jax.experimental.pallas import tpu as pltpu


def _subblock_kernel(x_ref, dww_ref, w_ref, b_ref, o_ref, *, K, pad_l, B_blk, T):
    """One grid step handles B_blk batch elements.

    x_ref   : (B_blk, Cin, T)   activations (NCT; time on lanes)
    dww_ref : (Cin, K)          depthwise taps (f32)
    w_ref   : (Cout, Cin)       folded pointwise weight (BN scale folded in)
    b_ref   : (Cout, 1)         folded bias (dw bias + pw bias + BN shift), f32
    o_ref   : (B_blk, Cout, T)
    """
    cin = x_ref.shape[1]
    dww = dww_ref[...]                                   # (Cin, K)  f32
    w = w_ref[...]                                       # (Cout, Cin)
    b = b_ref[...]                                       # (Cout, 1) f32

    # Precompute (hoist) per-tap roll amounts, edge masks and weight columns.
    t_idx = lax.broadcasted_iota(jnp.int32, (cin, T), 1)
    taps = []
    for k in range(K):
        d = k - pad_l                                    # time offset of tap k
        wk = dww[:, k:k + 1]                             # (Cin, 1)
        if d == 0:
            taps.append((0, None, wk))
        elif d > 0:
            taps.append(((-d) % T, t_idx < (T - d), wk))
        else:
            taps.append(((-d) % T, t_idx >= (-d), wk))

    for bi in range(B_blk):
        xb = x_ref[bi].astype(jnp.float32)               # (Cin, T)

        # Depthwise FIR along time: K lane-rotations (XLU) + masked MACs (VPU),
        # accumulated in f32.
        acc = jnp.zeros((cin, T), jnp.float32)
        for shift, mask, wk in taps:
            if shift == 0:
                shifted = xb
            else:
                shifted = pltpu.roll(xb, shift, 1)
            if mask is not None:
                shifted = jnp.where(mask, shifted, 0.0)
            acc = acc + shifted * wk

        # Pointwise conv (+ folded BN/bias) as one MXU matmul -> (Cout, T),
        # written lane-dense.
        y = jnp.dot(w, acc.astype(w.dtype), preferred_element_type=jnp.float32)
        y = jnp.maximum(y + b, 0.0)
        o_ref[bi] = y.astype(o_ref.dtype)


def subblock_forward(x_nct, params, kernel_size, *, block_batch=2,
                     act_dtype=jnp.float32):
    """x_nct: (N, Cin, T) -> (N, Cout, T) in act_dtype."""
    dw_w, dw_b, pw_w, pw_b, gamma, beta, r_mean, r_var = params
    N, Cin, T = x_nct.shape
    Cout = pw_w.shape[1]
    K = kernel_size
    eps = 1e-5

    # Fold BatchNorm (inference) + pointwise bias + depthwise bias into a
    # single matmul weight / bias.
    scale = gamma / jnp.sqrt(r_var + eps)                      # (Cout,)
    shift = beta - r_mean * scale                              # (Cout,)
    w_folded = (pw_w * scale[None, :]).T                       # (Cout, Cin)
    b_folded = scale * (dw_b @ pw_w + pw_b) + shift            # (Cout,)

    pad_l = (K - 1) // 2                                       # PyTorch 'same'

    # Largest divisor of N not exceeding block_batch (keeps >=1 full block).
    B_blk = max(1, min(block_batch, N))
    while N % B_blk:
        B_blk -= 1

    kernel = functools.partial(_subblock_kernel, K=K, pad_l=pad_l,
                               B_blk=B_blk, T=T)

    out = pl.pallas_call(
        kernel,
        out_shape=jax.ShapeDtypeStruct((N, Cout, T), act_dtype),
        grid_spec=pltpu.PrefetchScalarGridSpec(
            num_scalar_prefetch=0,
            grid=(N // B_blk,),
            in_specs=[
                pl.BlockSpec((B_blk, Cin, T), lambda n: (n, 0, 0)),
                pl.BlockSpec((Cin, K), lambda n: (0, 0)),
                pl.BlockSpec((Cout, Cin), lambda n: (0, 0)),
                pl.BlockSpec((Cout, 1), lambda n: (0, 0)),
            ],
            out_specs=pl.BlockSpec((B_blk, Cout, T), lambda n: (n, 0, 0)),
        ),
        compiler_params=pltpu.CompilerParams(
            dimension_semantics=("parallel",)),
    )(x_nct.astype(act_dtype),
      dw_w.T.astype(jnp.float32),                 # (Cin, K)
      w_folded.astype(act_dtype),                 # (Cout, Cin)
      b_folded.reshape(Cout, 1).astype(jnp.float32))
    return out


def subblock_reference(x_nct, params, kernel_size):
    """Pure-JAX f32 reference (same inference semantics)."""
    dw_w, dw_b, pw_w, pw_b, gamma, beta, r_mean, r_var = params
    N, Cin, T = x_nct.shape
    K = kernel_size
    eps = 1e-5
    pad_l = (K - 1) // 2
    pad_r = (K - 1) - pad_l

    dw = lax.conv_general_dilated(
        x_nct, dw_w.T[:, None, :],
        window_strides=(1,), padding=[(pad_l, pad_r)],
        dimension_numbers=("NCH", "OIH", "NCH"),
        feature_group_count=Cin)
    dw = dw + dw_b[None, :, None]

    pw = jnp.einsum("nct,co->not", dw, pw_w) + pw_b[None, :, None]

    scale = gamma / jnp.sqrt(r_var + eps)
    shift = beta - r_mean * scale
    bn = pw * scale[None, :, None] + shift[None, :, None]
    return jnp.maximum(bn, 0.0)


def make_params(key, in_channels, out_channels, kernel_size):
    k1, k2, k3, k4 = jax.random.split(key, 4)
    dw_w = jax.random.normal(k1, (kernel_size, in_channels), jnp.float32) * 0.3
    dw_b = jax.random.normal(k2, (in_channels,), jnp.float32) * 0.1
    pw_w = jax.random.normal(k3, (in_channels, out_channels), jnp.float32) * 0.2
    pw_b = jax.random.normal(k4, (out_channels,), jnp.float32) * 0.1
    gamma = jnp.linspace(0.8, 1.2, out_channels, dtype=jnp.float32)
    beta = jnp.linspace(-0.1, 0.1, out_channels, dtype=jnp.float32)
    r_mean = jnp.linspace(-0.05, 0.05, out_channels, dtype=jnp.float32)
    r_var = jnp.linspace(0.9, 1.1, out_channels, dtype=jnp.float32)
    return (dw_w, dw_b, pw_w, pw_b, gamma, beta, r_mean, r_var)


if __name__ == "__main__":
    N, Cin, Cout, T, K = 4, 16, 32, 128, 5
    key = jax.random.PRNGKey(0)
    kx, kp = jax.random.split(key)
    x = jax.random.normal(kx, (N, Cin, T), jnp.float32)
    params = make_params(kp, Cin, Cout, K)

    ref = subblock_reference(x, params, K)

    # f32 path (tight check).
    out = subblock_forward(x, params, K, block_batch=2, act_dtype=jnp.float32)
    out = jax.block_until_ready(out)
    assert out.shape == (N, Cout, T)
    assert jnp.allclose(out, ref, atol=1e-4, rtol=1e-4), (
        float(jnp.max(jnp.abs(out - ref))))

    # bf16 path (halves HBM bytes on v6e/v7x; f32 accumulation inside).
    out_bf16 = subblock_forward(x, params, K, block_batch=2,
                                act_dtype=jnp.bfloat16)
    out_bf16 = jax.block_until_ready(out_bf16)
    assert out_bf16.shape == (N, Cout, T)
    assert jnp.allclose(out_bf16.astype(jnp.float32), ref,
                        atol=1e-1, rtol=1e-1), (
        float(jnp.max(jnp.abs(out_bf16.astype(jnp.float32) - ref))))

    print("KERNEL_OK")
</pallas_src>

<mosaic_0001>
module attributes {stable_mosaic.version = 11 : i64} {
  func.func @_subblock_kernel(%arg0: i32, %arg1: memref<2x16x128xf32, #tpu.memory_space<vmem>>, %arg2: memref<16x5xf32, #tpu.memory_space<vmem>>, %arg3: memref<32x16xf32, #tpu.memory_space<vmem>>, %arg4: memref<32x1xf32, #tpu.memory_space<vmem>>, %arg5: memref<2x32x128xf32, #tpu.memory_space<vmem>>) attributes {dimension_semantics = [#tpu.dimension_semantics<parallel>], iteration_bounds = array<i64: 2>, scalar_prefetch = 0 : i64, scratch_operands = 0 : i64, tpu.core_type = #tpu.core_type<tc>, window_params = [{transform_indices = @transform_0, window_bounds = array<i64: 2, 16, 128>}, {pipeline_mode = #tpu.pipeline_mode<synchronous>, transform_indices = @transform_1, window_bounds = array<i64: 16, 5>}, {pipeline_mode = #tpu.pipeline_mode<synchronous>, transform_indices = @transform_2, window_bounds = array<i64: 32, 16>}, {pipeline_mode = #tpu.pipeline_mode<synchronous>, transform_indices = @transform_3, window_bounds = array<i64: 32, 1>}, {transform_indices = @transform_4, window_bounds = array<i64: 2, 32, 128>}]} {
    %c0 = arith.constant 0 : index
    %c0_0 = arith.constant 0 : index
    %0 = vector.load %arg2[%c0, %c0_0] : memref<16x5xf32, #tpu.memory_space<vmem>>, vector<16x5xf32>
    %c0_1 = arith.constant 0 : index
    %c0_2 = arith.constant 0 : index
    %1 = vector.load %arg3[%c0_1, %c0_2] : memref<32x16xf32, #tpu.memory_space<vmem>>, vector<32x16xf32>
    %c0_3 = arith.constant 0 : index
    %c0_4 = arith.constant 0 : index
    %2 = vector.load %arg4[%c0_3, %c0_4] : memref<32x1xf32, #tpu.memory_space<vmem>>, vector<32x1xf32>
    %3 = tpu.iota {dimensions = array<i32: 1>} : vector<16x128xi32>
    %4 = vector.extract_strided_slice %0 {offsets = [0, 0], sizes = [16, 1], strides = [1, 1]} : vector<16x5xf32> to vector<16x1xf32>
    %c2_i32 = arith.constant 2 : i32
    %5 = vector.broadcast %c2_i32 : i32 to vector<16x128xi32>
    %6 = arith.cmpi sge, %3, %5 : vector<16x128xi32>
    %7 = vector.extract_strided_slice %0 {offsets = [0, 1], sizes = [16, 1], strides = [1, 1]} : vector<16x5xf32> to vector<16x1xf32>
    %c1_i32 = arith.constant 1 : i32
    %8 = vector.broadcast %c1_i32 : i32 to vector<16x128xi32>
    %9 = arith.cmpi sge, %3, %8 : vector<16x128xi32>
    %10 = vector.extract_strided_slice %0 {offsets = [0, 2], sizes = [16, 1], strides = [1, 1]} : vector<16x5xf32> to vector<16x1xf32>
    %11 = vector.extract_strided_slice %0 {offsets = [0, 3], sizes = [16, 1], strides = [1, 1]} : vector<16x5xf32> to vector<16x1xf32>
    %c127_i32 = arith.constant 127 : i32
    %12 = vector.broadcast %c127_i32 : i32 to vector<16x128xi32>
    %13 = arith.cmpi slt, %3, %12 : vector<16x128xi32>
    %14 = vector.extract_strided_slice %0 {offsets = [0, 4], sizes = [16, 1], strides = [1, 1]} : vector<16x5xf32> to vector<16x1xf32>
    %c126_i32 = arith.constant 126 : i32
    %15 = vector.broadcast %c126_i32 : i32 to vector<16x128xi32>
    %16 = arith.cmpi slt, %3, %15 : vector<16x128xi32>
    %c0_5 = arith.constant 0 : index
    %c0_6 = arith.constant 0 : index
    %c0_7 = arith.constant 0 : index
    %17 = vector.load %arg1[%c0_5, %c0_6, %c0_7] : memref<2x16x128xf32, #tpu.memory_space<vmem>>, vector<1x16x128xf32>
    %18 = vector.shape_cast %17 : vector<1x16x128xf32> to vector<16x128xf32>
    %cst = arith.constant 0.000000e+00 : f32
    %19 = vector.broadcast %cst : f32 to vector<16x128xf32>
    %c2_i32_8 = arith.constant 2 : i32
    %20 = tpu.dynamic_rotate %18 by %c2_i32_8 dim 1 : vector<16x128xf32>, i32 -> vector<16x128xf32>
    %cst_9 = arith.constant 0.000000e+00 : f32
    %21 = vector.broadcast %cst_9 : f32 to vector<16x128xf32>
    %22 = arith.select %6, %20, %21 : vector<16x128xi1>, vector<16x128xf32>
    %23 = vector.broadcast %4 : vector<16x1xf32> to vector<16x128xf32>
    %24 = arith.mulf %22, %23 : vector<16x128xf32>
    %25 = arith.addf %19, %24 : vector<16x128xf32>
    %c1_i32_10 = arith.constant 1 : i32
    %26 = tpu.dynamic_rotate %18 by %c1_i32_10 dim 1 : vector<16x128xf32>, i32 -> vector<16x128xf32>
    %cst_11 = arith.constant 0.000000e+00 : f32
    %27 = vector.broadcast %cst_11 : f32 to vector<16x128xf32>
    %28 = arith.select %9, %26, %27 : vector<16x128xi1>, vector<16x128xf32>
    %29 = vector.broadcast %7 : vector<16x1xf32> to vector<16x128xf32>
    %30 = arith.mulf %28, %29 : vector<16x128xf32>
    %31 = arith.addf %25, %30 : vector<16x128xf32>
    %32 = vector.broadcast %10 : vector<16x1xf32> to vector<16x128xf32>
    %33 = arith.mulf %18, %32 : vector<16x128xf32>
    %34 = arith.addf %31, %33 : vector<16x128xf32>
    %c127_i32_12 = arith.constant 127 : i32
    %35 = tpu.dynamic_rotate %18 by %c127_i32_12 dim 1 : vector<16x128xf32>, i32 -> vector<16x128xf32>
    %cst_13 = arith.constant 0.000000e+00 : f32
    %36 = vector.broadcast %cst_13 : f32 to vector<16x128xf32>
    %37 = arith.select %13, %35, %36 : vector<16x128xi1>, vector<16x128xf32>
    %38 = vector.broadcast %11 : vector<16x1xf32> to vector<16x128xf32>
    %39 = arith.mulf %37, %38 : vector<16x128xf32>
    %40 = arith.addf %34, %39 : vector<16x128xf32>
    %c126_i32_14 = arith.constant 126 : i32
    %41 = tpu.dynamic_rotate %18 by %c126_i32_14 dim 1 : vector<16x128xf32>, i32 -> vector<16x128xf32>
    %cst_15 = arith.constant 0.000000e+00 : f32
    %42 = vector.broadcast %cst_15 : f32 to vector<16x128xf32>
    %43 = arith.select %16, %41, %42 : vector<16x128xi1>, vector<16x128xf32>
    %44 = vector.broadcast %14 : vector<16x1xf32> to vector<16x128xf32>
    %45 = arith.mulf %43, %44 : vector<16x128xf32>
    %46 = arith.addf %40, %45 : vector<16x128xf32>
    %cst_16 = arith.constant dense<0.000000e+00> : vector<32x128xf32>
    %47 = tpu.matmul %1, %46, %cst_16 {dimension_numbers = #tpu.dot_dimension_numbers<[1], [0], [0], [1], [0, 0, 1, 1], [], []>} : vector<32x16xf32>, vector<16x128xf32>, vector<32x128xf32> -> vector<32x128xf32>
    %48 = vector.broadcast %2 : vector<32x1xf32> to vector<32x128xf32>
    %49 = arith.addf %47, %48 : vector<32x128xf32>
    %cst_17 = arith.constant 0.000000e+00 : f32
    %50 = vector.broadcast %cst_17 : f32 to vector<32x128xf32>
    %51 = arith.maximumf %49, %50 : vector<32x128xf32>
    %c0_18 = arith.constant 0 : index
    %c0_19 = arith.constant 0 : index
    %c0_20 = arith.constant 0 : index
    %52 = vector.load %arg5[%c0_18, %c0_19, %c0_20] : memref<2x32x128xf32, #tpu.memory_space<vmem>>, vector<1x32x128xf32>
    %53 = vector.shape_cast %52 : vector<1x32x128xf32> to vector<32x128xf32>
    %54 = vector.shape_cast %51 : vector<32x128xf32> to vector<1x32x128xf32>
    tpu.vector_store %arg5[%c0_18, %c0_19, %c0_20], %54 {strides = array<i32>} : memref<2x32x128xf32, #tpu.memory_space<vmem>>, vector<1x32x128xf32>,
    %c1 = arith.constant 1 : index
    %c0_21 = arith.constant 0 : index
    %c0_22 = arith.constant 0 : index
    %55 = vector.load %arg1[%c1, %c0_21, %c0_22] : memref<2x16x128xf32, #tpu.memory_space<vmem>>, vector<1x16x128xf32>
    %56 = vector.shape_cast %55 : vector<1x16x128xf32> to vector<16x128xf32>
    %cst_23 = arith.constant 0.000000e+00 : f32
    %57 = vector.broadcast %cst_23 : f32 to vector<16x128xf32>
    %c2_i32_24 = arith.constant 2 : i32
    %58 = tpu.dynamic_rotate %56 by %c2_i32_24 dim 1 : vector<16x128xf32>, i32 -> vector<16x128xf32>
    %cst_25 = arith.constant 0.000000e+00 : f32
    %59 = vector.broadcast %cst_25 : f32 to vector<16x128xf32>
    %60 = arith.select %6, %58, %59 : vector<16x128xi1>, vector<16x128xf32>
    %61 = vector.broadcast %4 : vector<16x1xf32> to vector<16x128xf32>
    %62 = arith.mulf %60, %61 : vector<16x128xf32>
    %63 = arith.addf %57, %62 : vector<16x128xf32>
    %c1_i32_26 = arith.constant 1 : i32
    %64 = tpu.dynamic_rotate %56 by %c1_i32_26 dim 1 : vector<16x128xf32>, i32 -> vector<16x128xf32>
    %cst_27 = arith.constant 0.000000e+00 : f32
    %65 = vector.broadcast %cst_27 : f32 to vector<16x128xf32>
    %66 = arith.select %9, %64, %65 : vector<16x128xi1>, vector<16x128xf32>
    %67 = vector.broadcast %7 : vector<16x1xf32> to vector<16x128xf32>
    %68 = arith.mulf %66, %67 : vector<16x128xf32>
    %69 = arith.addf %63, %68 : vector<16x128xf32>
    %70 = vector.broadcast %10 : vector<16x1xf32> to vector<16x128xf32>
    %71 = arith.mulf %56, %70 : vector<16x128xf32>
    %72 = arith.addf %69, %71 : vector<16x128xf32>
    %c127_i32_28 = arith.constant 127 : i32
    %73 = tpu.dynamic_rotate %56 by %c127_i32_28 dim 1 : vector<16x128xf32>, i32 -> vector<16x128xf32>
    %cst_29 = arith.constant 0.000000e+00 : f32
    %74 = vector.broadcast %cst_29 : f32 to vector<16x128xf32>
    %75 = arith.select %13, %73, %74 : vector<16x128xi1>, vector<16x128xf32>
    %76 = vector.broadcast %11 : vector<16x1xf32> to vector<16x128xf32>
    %77 = arith.mulf %75, %76 : vector<16x128xf32>
    %78 = arith.addf %72, %77 : vector<16x128xf32>
    %c126_i32_30 = arith.constant 126 : i32
    %79 = tpu.dynamic_rotate %56 by %c126_i32_30 dim 1 : vector<16x128xf32>, i32 -> vector<16x128xf32>
    %cst_31 = arith.constant 0.000000e+00 : f32
    %80 = vector.broadcast %cst_31 : f32 to vector<16x128xf32>
    %81 = arith.select %16, %79, %80 : vector<16x128xi1>, vector<16x128xf32>
    %82 = vector.broadcast %14 : vector<16x1xf32> to vector<16x128xf32>
    %83 = arith.mulf %81, %82 : vector<16x128xf32>
    %84 = arith.addf %78, %83 : vector<16x128xf32>
    %cst_32 = arith.constant dense<0.000000e+00> : vector<32x128xf32>
    %85 = tpu.matmul %1, %84, %cst_32 {dimension_numbers = #tpu.dot_dimension_numbers<[1], [0], [0], [1], [0, 0, 1, 1], [], []>} : vector<32x16xf32>, vector<16x128xf32>, vector<32x128xf32> -> vector<32x128xf32>
    %86 = vector.broadcast %2 : vector<32x1xf32> to vector<32x128xf32>
    %87 = arith.addf %85, %86 : vector<32x128xf32>
    %cst_33 = arith.constant 0.000000e+00 : f32
    %88 = vector.broadcast %cst_33 : f32 to vector<32x128xf32>
    %89 = arith.maximumf %87, %88 : vector<32x128xf32>
    %c1_34 = arith.constant 1 : index
    %c0_35 = arith.constant 0 : index
    %c0_36 = arith.constant 0 : index
    %90 = vector.load %arg5[%c1_34, %c0_35, %c0_36] : memref<2x32x128xf32, #tpu.memory_space<vmem>>, vector<1x32x128xf32>
    %91 = vector.shape_cast %90 : vector<1x32x128xf32> to vector<32x128xf32>
    %92 = vector.shape_cast %89 : vector<32x128xf32> to vector<1x32x128xf32>
    tpu.vector_store %arg5[%c1_34, %c0_35, %c0_36], %92 {strides = array<i32>} : memref<2x32x128xf32, #tpu.memory_space<vmem>>, vector<1x32x128xf32>,
    return
  }
  func.func @transform_0(%arg0: i32) -> (i32, i32, i32) {
    %c0_i32 = arith.constant 0 : i32
    %c0_i32_0 = arith.constant 0 : i32
    %c0_i32_1 = arith.constant 0 : i32
    return %arg0, %c0_i32, %c0_i32_0 : i32, i32, i32
  }
  func.func @transform_1(%arg0: i32) -> (i32, i32) {
    %c0_i32 = arith.constant 0 : i32
    %c0_i32_0 = arith.constant 0 : i32
    %c0_i32_1 = arith.constant 0 : i32
    return %c0_i32, %c0_i32_0 : i32, i32
  }
  func.func @transform_2(%arg0: i32) -> (i32, i32) {
    %c0_i32 = arith.constant 0 : i32
    %c0_i32_0 = arith.constant 0 : i32
    %c0_i32_1 = arith.constant 0 : i32
    return %c0_i32, %c0_i32_0 : i32, i32
  }
  func.func @transform_3(%arg0: i32) -> (i32, i32) {
    %c0_i32 = arith.constant 0 : i32
    %c0_i32_0 = arith.constant 0 : i32
    %c0_i32_1 = arith.constant 0 : i32
    return %c0_i32, %c0_i32_0 : i32, i32
  }
  func.func @transform_4(%arg0: i32) -> (i32, i32, i32) {
    %c0_i32 = arith.constant 0 : i32
    %c0_i32_0 = arith.constant 0 : i32
    %c0_i32_1 = arith.constant 0 : i32
    return %arg0, %c0_i32, %c0_i32_0 : i32, i32, i32
  }
}

</mosaic_0001>

<bundles_post_ra>
// kernel: tpu_custom_call.1
= control target key start
LH: loop header
LB: loop body
LE: loop exit
PB: predicated region body
PF: predicated region fallthrough
CT: control target
= control target key end

     0   :  { %9 = vsyncpa [#allocation3], 0  ;;  %s1085_s0 = inlined_call_operand.vmem [shape: f32[4,16,128], index: 0, kind: input, shape index: {}]   ;;  %s1086_s1 = inlined_call_operand.vmem [shape: f32[16,5], index: 1, kind: input, shape index: {}]   ;;  %s1087_s2 = inlined_call_operand.vmem [shape: f32[32,16], index: 2, kind: input, shape index: {}]   ;;  %s1088_s3 = inlined_call_operand.vmem [shape: f32[32,1], index: 3, kind: input, shape index: {}]   ;;  %s1089_s4 = inlined_call_operand.hbm [shape: f32[4,32,128], index: 4, kind: output, shape index: {}]  }
   0x1   :  { %11 = vsyncpa [#allocation3 + $0x1], 0  ;;  %s872_s15 = smov 0   ;;  %s874_s16 = smov 0  }
   0x2   :  { %s876_s17 = smov 0   ;;  %s878_s18 = smov 0  }
   0x3 LB: > { %s893_s19 = sadd.s32 4294967295, %s833_s18   ;;  %s650_s20 = sadd.s32 4294967294, %s833_s18   ;;  %s833_s18 = sphi %s878_s18, %s1095_s18   ;;  %s829_s17 = sphi %s876_s17, %s1094_s17   ;;  %s825_s16 = sphi %s874_s16, %s1093_s16   ;;  %s821_s15 = sphi %s872_s15, %s1092_s15  }
   0x4   : > { %s897_s21 = sadd.s32 1, %s833_s18   ;;  %s113_s22 = sadd.s32 1, %s829_s17 }
   0x5   : > { %s110_s23 = ssub.s32 %s833_s18, %s897_s21  ;;  %p123_p0 = scmp.ne.s32.totalorder %s829_s17, %s825_s16 }
   0x6   : > { %p111_p1 = scmp.eq.s32.totalorder %s110_s23, 0  ;;  %p124_p2 = scmp.eq.s32.totalorder %s893_s19, 1 }
   0x7   : > { %p129_p3 = scmp.ne.s32.totalorder %s825_s16, %s821_s15  ;;  %p130_p4 = scmp.eq.s32.totalorder %s650_s20, 1 }
   0x8   : > { %s908_s24 = scalar_select %p111_p1, %s829_s17, %s113_s22  }
   0x9   : > { %p910_p5 = por %p124_p2, %p123_p0  ;;  %p914_p6 = por %p130_p4, %p129_p3 }
   0xa   : > { %p653_p7 = scmp.ge.s32.totalorder %s833_s18, 1  ;;  %p167_p8 = scmp.lt.s32.totalorder %s833_s18, 3 }
   0xc   : > { %p168_p9 = pnand %p653_p7, %p167_p8 }
   0xd   : > { %s655_s5 = sshll.u32 (!%p168_p9), %s893_s19, 1  ;;  %s838_s10 = smov (!%p168_p9), 2  }
   0xe   : > { %171 = sbr.rel (%p168_p9) target bundleno = 423 (0x1a7), region = 36  ;;  %p195_p10 = scmp.lt.s32.totalorder (!%p168_p9), %s655_s5, 3 }
   0xf   : > { %s839_s11 = smov (!%p168_p9), 1   ;;  %s842_s12 = smov (!%p168_p9), 127  }
  0x10   : > { %s843_s13 = smov (!%p168_p9), 126   ;;  %s680_s22 = sshll.u32 (!%p168_p9), %s893_s19, 10 }
  0x11   : > { %s1039_s29 = scalar_lea.hbm (!%p168_p9), %s1089_s4, %s680_s22 }
  0x13   : > { %v203_v0 = vld [vmem:[%s1086_s1 + $0x8] sm:$0xff]  ;;  %v202_v1 = vld [vmem:[%s1086_s1] sm:$0xff]  ;;  %v835_v2 = vmov 1   ;;  %v836_v3 = vmov 0   ;;  %s1097_s5 = smov (!%p195_p10, %s655_s5), 3  ;;  %v837_v4 = vmov 2   ;;  %v212_v24 = vlaneseq }
  0x14   : > { %763 = vset.pattern.permute.xlu0 %v835_v2  ;;  %764 = vset.pattern.permute.xlu1 %v836_v3  ;;  %s678_s6 = sshll.u32 %s1097_s5, 4  ;;  %v840_v7 = vmov 3   ;;  %v841_v9 = vmov 4   ;;  %v209_v11 = vld [vmem:[%s1088_s3 + $0x8] sm:$0xff]  ;;  %v204_v12 = vld [vmem:[%s1087_s2] sm:$0xff]  ;;  %vm326_vm0 = vcmask 130048  }
  0x15   : > { %251 = vperm.xlu0 %763, %v203_v0   ;;  %228 = vperm.xlu1 %764, %v202_v1   ;;  %s199_s9 = scalar_lea.vmem %s1085_s0, %s678_s6  ;;  %v208_v13 = vld [vmem:[%s1088_s3] sm:$0xff]  ;;  %v210_v14 = vld [vmem:[%s1088_s3 + $0x10] sm:$0xff]  ;;  %v211_v15 = vld [vmem:[%s1088_s3 + $0x18] sm:$0xff]  ;;  %v973_v27 = vand.u32 127, %v212_v24  ;;  %s844_s5 = smov [#allocation2]  }
  0x16   : > { %v930_v5 = vld [vmem:[%s199_s9 + $0x8] sm:$0xff]  ;;  %v933_v6 = vld [vmem:[%s199_s9 + $0x18] sm:$0xff]  ;;  %v937_v8 = vld [vmem:[%s199_s9] sm:$0xff]  ;;  %707 = vmatprep.mubr.msk.f32.mxu1 %vm326_vm0, %v204_v12  ;;  %697 = vmatprep.mubr.msk.f32.mxu0 %vm326_vm0, %v204_v12  ;;  %s777_s6 = sshll.u32 %s844_s5, 4  ;;  %s778_s6 = int_to_ptr.vmem [resolvable:$false] %s777_s6 }
  0x17   : > { %v943_v10 = vld [vmem:[%s199_s9 + $0x10] sm:$0xff]  ;;  %vm214_vm1 = vcmp.ge.s32.totalorder %v973_v27, 2  ;;  %vm215_vm2 = vcmp.ge.s32.totalorder %v973_v27, 1  ;;  %vm216_vm3 = vcmp.lt.s32.totalorder %v973_v27, 127  ;;  %vm217_vm4 = vcmp.lt.s32.totalorder %v973_v27, 126  ;;  %s779_s7 = scalar_lea.vmem %s778_s6, 2048 }
  0x19   : > { %765 = vset.pattern.permute.xlu1 %v835_v2  ;;  %767 = vset.pattern.permute.xlu0 %v837_v4 }
  0x1a   : > { %247 = vperm.xlu1 %765, %v202_v1   ;;  %222 = vrot.lane.b32.xlu0 %v930_v5, %s838_s10 }
  0x1e   : > { %766 = vset.pattern.permute.xlu1 %v837_v4  ;;  %259 = vperm.xlu0 %767, %v202_v1  }
  0x1f   : > { %263 = vperm.xlu1 %766, %v203_v0  }
  0x22   : > { %447 = vrot.lane.b32.xlu0 %v933_v6, %s839_s11 }
  0x23   : > { %242 = vrot.lane.b32.xlu1 %v930_v5, %s839_s11  ;;  %769 = vset.pattern.permute.xlu0 %v841_v9 }
  0x24   : > { %768 = vset.pattern.permute.xlu1 %v840_v7 }
  0x26   : > { %240 = vrot.lane.b32.xlu0 %v937_v8, %s839_s11 }
  0x27   : > { %281 = vperm.xlu1 %768, %v203_v0  }
  0x2a   : > { %299 = vperm.xlu0 %769, %v203_v0  }
  0x2b   : > { %437 = vrot.lane.b32.xlu1 %v933_v6, %s838_s10 }
  0x2e   : > { %770 = vset.pattern.permute.xlu0 %v836_v3 }
  0x2f   : > { %220 = vrot.lane.b32.xlu1 %v937_v8, %s838_s10  ;;  %233 = vperm.xlu0 %770, %v203_v0  }
  0x33   : > { %277 = vperm.xlu1 %768, %v202_v1   ;;  %272 = vrot.lane.b32.xlu0 %v930_v5, %s842_s12 }
  0x37   : > { %435 = vrot.lane.b32.xlu1 %v943_v10, %s838_s10  ;;  %461 = vrot.lane.b32.xlu0 %v933_v6, %s842_s12 }
  0x38   : > { %771 = vset.pattern.permute.xlu1 %v841_v9 }
  0x3b   : > { %445 = vrot.lane.b32.xlu1 %v943_v10, %s839_s11  ;;  %290 = vrot.lane.b32.xlu0 %v930_v5, %s843_s13 }
  0x3f   : > { %295 = vperm.xlu1 %771, %v202_v1   ;;  %471 = vrot.lane.b32.xlu0 %v933_v6, %s843_s13 }
  0x43   : > { %270 = vrot.lane.b32.xlu1 %v937_v8, %s842_s12  ;;  %469 = vrot.lane.b32.xlu0 %v943_v10, %s843_s13 }
  0x44   : > { %772 = vset.pattern.permute.xlu1 %v836_v3 }
  0x47   : > { %459 = vrot.lane.b32.xlu1 %v943_v10, %s842_s12  ;;  %313 = vperm.xlu0 %770, %v209_v11  }
  0x4b   : > { %288 = vrot.lane.b32.xlu1 %v937_v8, %s843_s13  ;;  %s191_s13 = sand.u32 1, %s825_s16  }
  0x4c   : > { %s654_s14 = sshll.u32 %s191_s13, 6  ;;  %s1045_s19 = scalar_lea.sflag [#allocation3], %s191_s13 }
  0x4d   : > { %s193_s20 = scalar_lea.vmem [#allocation2], %s654_s14 }
  0x4e   : > { %s588_s23 = sshll.u32 %s193_s20, 4  ;;  %s1041_s23 = int_to_ptr.vmem [resolvable:$true] %s588_s23 }
  0x4f   : > { %308 = vperm.xlu1 %772, %v208_v13   ;;  %s773_s30 = scalar_lea.vmem %s1041_s23, 1024  ;;  %p780_p0 = scmp.lt.s32.totalorder %s1041_s23, %s778_s6 }
  0x50   : > { %p774_p11 = scmp.ne.s32.totalorder %s1041_s23, %s773_s30  ;;  %p781_p1 = scmp.lt.s32.totalorder %s779_s7, %s773_s30 }
  0x52   : > { %p775_p12 = pnand %p774_p11, %p910_p5  ;;  %p782_p2 = por %p781_p1, %p780_p0 }
  0x53   : > { %318 = vperm.xlu1 %772, %v210_v14  }
  0x54   : > { %p776_p13 = pneg %p775_p12 }
  0x56   : > { %p783_p3 = pnand %p782_p2, %p776_p13 }
  0x57   : > { %323 = vperm.xlu1 %772, %v211_v15  }
  0x90   : > { %v252_v16 = vpop.permute.xlu0 %251  ;;  %v229_v17 = vpop.permute.xlu1 %228 }
  0x94   : > { %v223_v19 = vpop.permute.xlu0 %222 }
  0x95   : > { %v248_v18 = vpop.permute.xlu1 %247  ;;  %v225_v32 = vsel %vm214_vm1, %v223_v19, 0.0 }
  0x99   : > { %v971_v21 = vpop.permute.xlu0 %259 }
  0x9a   : > { %v264_v20 = vpop.permute.xlu1 %263 }
  0x9b   : > { %v267_v43 = vmul.f32 %v264_v20, %v930_v5  ;;  %v456_v53 = vmul.f32 %v933_v6, %v264_v20 }
  0x9d   : > { %v448_v23 = vpop.permute.xlu0 %447 }
  0x9e   : > { %v243_v22 = vpop.permute.xlu1 %242  ;;  %v450_v39 = vsel %vm215_vm2, %v448_v23, 0.0 }
  0x9f   : > { %v245_v33 = vsel %vm215_vm2, %v243_v22, 0.0  ;;  %v452_v46 = vmul.f32 %v450_v39, %v252_v16 }
  0xa0   : > { %v255_v36 = vmul.f32 %v252_v16, %v245_v33  ;;  %v455_v16 = vmul.f32 %v943_v10, %v971_v21 }
  0xa1   : > { %v241_v26 = vpop.permute.xlu0 %240 }
  0xa2   : > { %v282_v25 = vpop.permute.xlu1 %281  ;;  %v244_v3 = vsel %vm215_vm2, %v241_v26, 0.0 }
  0xa3   : > { %v254_v12 = vmul.f32 %v248_v18, %v244_v3 }
  0xa5   : > { %v300_v29 = vpop.permute.xlu0 %299 }
  0xa6   : > { %v438_v28 = vpop.permute.xlu1 %437 }
  0xa7   : > { %v440_v40 = vsel %vm214_vm1, %v438_v28, 0.0 }
  0xaa   : > { %v221_v30 = vpop.permute.xlu1 %220  ;;  %v234_v31 = vpop.permute.xlu0 %233 }
  0xab   : > { %v237_v34 = vmul.f32 %v234_v31, %v225_v32  ;;  %v442_v44 = vmul.f32 %v440_v40, %v234_v31  ;;  %v224_v60 = vsel %vm214_vm1, %v221_v30, 0.0 }
  0xac   : > { %v236_v6 = vmul.f32 %v229_v17, %v224_v60 }
  0xad   : > { %v257_v38 = vadd.f32 %v255_v36, %v237_v34  ;;  %v454_v51 = vadd.f32 %v452_v46, %v442_v44  ;;  %v205_v34 = vld [vmem:[%s1087_s2 + $0x8] sm:$0xff] }
  0xae   : > { %v278_v35 = vpop.permute.xlu1 %277  ;;  %v273_v37 = vpop.permute.xlu0 %272  ;;  %v256_v19 = vadd.f32 %v254_v12, %v236_v6 }
  0xaf   : > { %v275_v41 = vsel %vm216_vm3, %v273_v37, 0.0  ;;  %v269_v48 = vadd.f32 %v267_v43, %v257_v38  ;;  %v458_v0 = vadd.f32 %v456_v53, %v454_v51 }
  0xb0   : > { %v285_v47 = vmul.f32 %v282_v25, %v275_v41 }
  0xb2   : > { %v436_v42 = vpop.permute.xlu1 %435  ;;  %v462_v45 = vpop.permute.xlu0 %461  ;;  %v287_v58 = vadd.f32 %v285_v47, %v269_v48 }
  0xb3   : > { %v464_v49 = vsel %vm216_vm3, %v462_v45, 0.0  ;;  %v439_v61 = vsel %vm214_vm1, %v436_v42, 0.0 }
  0xb4   : > { %v466_v55 = vmul.f32 %v464_v49, %v282_v25  ;;  %v441_v7 = vmul.f32 %v439_v61, %v229_v17 }
  0xb6   : > { %v446_v50 = vpop.permute.xlu1 %445  ;;  %v291_v52 = vpop.permute.xlu0 %290  ;;  %v468_v5 = vadd.f32 %v466_v55, %v458_v0 }
  0xb7   : > { %v293_v54 = vsel %vm217_vm4, %v291_v52, 0.0  ;;  %v449_v56 = vsel %vm215_vm2, %v446_v50, 0.0 }
  0xb8   : > { %v303_v57 = vmul.f32 %v300_v29, %v293_v54  ;;  %v451_v1 = vmul.f32 %v449_v56, %v248_v18  ;;  %v266_v18 = vmul.f32 %v971_v21, %v937_v8  ;;  %v206_v8 = vld [vmem:[%s1087_s2 + $0x10] sm:$0xff]  ;;  %v207_v21 = vld [vmem:[%s1087_s2 + $0x18] sm:$0xff] }
  0xba   : > { %v296_v59 = vpop.permute.xlu1 %295  ;;  %v472_v62 = vpop.permute.xlu0 %471  ;;  %v305_v63 = vadd.f32 %v303_v57, %v287_v58  ;;  %v453_v13 = vadd.f32 %v451_v1, %v441_v7  ;;  %v268_v26 = vadd.f32 %v266_v18, %v256_v19 }
  0xbb   : > { %v474_v2 = vsel %vm217_vm4, %v472_v62, 0.0 }
  0xbc   : > { %v476_v4 = vmul.f32 %v474_v2, %v300_v29  ;;  %693 = vmatprep.subr.mxu0 %v305_v63  ;;  %v457_v24 = vadd.f32 %v455_v16, %v453_v13 }
  0xbd   : > { %694 = vmatpush3.msra.mxu0 %v305_v63 }
  0xbe   : > { %v271_v9 = vpop.permute.xlu1 %270  ;;  %v478_v11 = vadd.f32 %v476_v4, %v468_v5  ;;  %v470_v14 = vpop.permute.xlu0 %469 }
  0xbf   : > { %v274_v15 = vsel %vm216_vm3, %v271_v9, 0.0  ;;  %v473_v22 = vsel %vm217_vm4, %v470_v14, 0.0 }
  0xc0   : > { %703 = vmatprep.subr.mxu1 %v478_v11  ;;  %v284_v23 = vmul.f32 %v278_v35, %v274_v15  ;;  %v475_v28 = vmul.f32 %v473_v22, %v296_v59 }
  0xc1   : > { %704 = vmatpush3.msra.mxu1 %v478_v11 }
  0xc2   : > { %v460_v20 = vpop.permute.xlu1 %459  ;;  %v286_v31 = vadd.f32 %v284_v23, %v268_v26  ;;  %v314_v37 = vpop.permute.xlu0 %313 }
  0xc3   : > { %v463_v17 = vsel %vm216_vm3, %v460_v20, 0.0 }
  0xc4   : > { %v465_v25 = vmul.f32 %v463_v17, %v278_v35 }
  0xc6   : > { %v467_v29 = vadd.f32 %v465_v25, %v457_v24  ;;  %v289_v30 = vpop.permute.xlu1 %288 }
  0xc7   : > { %v292_v10 = vsel %vm217_vm4, %v289_v30, 0.0 }
  0xc8   : > { %v302_v32 = vmul.f32 %v296_v59, %v292_v10  ;;  %v477_v33 = vadd.f32 %v475_v28, %v467_v29 }
  0xca   : > { %v304_v36 = vadd.f32 %v302_v32, %v286_v31  ;;  %705 = vmatprep.subr.mxu1 %v477_v33  ;;  %v309_v27 = vpop.permute.xlu1 %308 }
  0xcb   : > { %706 = vmatpush3.msra.mxu1 %v477_v33 }
  0xcc   : > { %695 = vmatprep.subr.mxu0 %v304_v36  ;;  %708 = vmatmul.mubr.msk.f32.vlgmr.msra.gmra.mxu1 %vm326_vm0, %v205_v34 }
  0xcd   : > { %696 = vmatpush3.msra.mxu0 %v304_v36  ;;  %710 = vmatprep.mubr.msk.f32.mxu1 %vm326_vm0, %v206_v8 }
  0xce   : > { %698 = vmatmul.mubr.msk.f32.vlgmr.msra.gmra.mxu0 %vm326_vm0, %v205_v34  ;;  %v319_v35 = vpop.permute.xlu1 %318 }
  0xcf   : > { %700 = vmatprep.mubr.msk.f32.mxu0 %vm326_vm0, %v206_v8 }
  0xd0   : > { %711 = vmatmul.mubr.msk.f32.gmra.mxu1 %vm326_vm0, %v207_v21 }
  0xd2   : > { %701 = vmatmul.mubr.msk.f32.gmra.mxu0 %vm326_vm0, %v207_v21  ;;  %v324_v43 = vpop.permute.xlu1 %323 }
 0x18c   : > { %v709_v38 = vpop.f32.mrf.mxu1 }
 0x18d   : > { %v551_v39 = vadd.f32 %v709_v38, %v314_v37 }
 0x18e   : > { %v699_v40 = vpop.f32.mrf.mxu0  ;;  %v545_v41 = vpop.f32.mrf.mxu1 }
 0x18f   : > { %v565_v42 = vmax.f32 %v551_v39, 0.0  ;;  %v411_v44 = vadd.f32 %v699_v40, %v314_v37  ;;  %v546_v45 = vadd.f32 %v545_v41, %v309_v27 }
 0x190   : > { %v405_v46 = vpop.f32.mrf.mxu0  ;;  %v712_v47 = vpop.f32.mrf.mxu1 }
 0x191   : > { %669 = vst [vmem:[%s193_s20 + $0x28] sm:$0xff] %v565_v42  ;;  %v425_v48 = vmax.f32 %v411_v44, 0.0  ;;  %v564_v49 = vmax.f32 %v546_v45, 0.0  ;;  %v406_v50 = vadd.f32 %v405_v46, %v309_v27  ;;  %v561_v51 = vadd.f32 %v712_v47, %v324_v43 }
 0x192   : > { %v702_v52 = vpop.f32.mrf.mxu0  ;;  %v555_v53 = vpop.f32.mrf.mxu1 }
 0x193   : > { %429 = vst [vmem:[%s193_s20 + $0x8] sm:$0xff] %v425_v48  ;;  %668 = vst [vmem:[%s193_s20 + $0x20] sm:$0xff] %v564_v49  ;;  %v424_v54 = vmax.f32 %v406_v50, 0.0  ;;  %v567_v55 = vmax.f32 %v561_v51, 0.0  ;;  %v421_v56 = vadd.f32 %v702_v52, %v324_v43  ;;  %v556_v57 = vadd.f32 %v555_v53, %v319_v35 }
 0x194   : > { %v415_v58 = vpop.f32.mrf.mxu0 }
 0x195   : > { %428 = vst [vmem:[%s193_s20] sm:$0xff] %v424_v54  ;;  %671 = vst [vmem:[%s193_s20 + $0x38] sm:$0xff] %v567_v55  ;;  %v427_v59 = vmax.f32 %v421_v56, 0.0  ;;  %v566_v60 = vmax.f32 %v556_v57, 0.0  ;;  %v416_v61 = vadd.f32 %v415_v58, %v319_v35 }
 0x197   : > { %431 = vst [vmem:[%s193_s20 + $0x18] sm:$0xff] %v427_v59  ;;  %670 = vst [vmem:[%s193_s20 + $0x30] sm:$0xff] %v566_v60  ;;  %v426_v62 = vmax.f32 %v416_v61, 0.0 }
 0x199   : > { %430 = vst [vmem:[%s193_s20 + $0x10] sm:$0xff] %v426_v62 }
 0x19a   : > { %786 = shalt.err (!%p783_p3)
}
 0x19b   : > { %s787_s8 = scalar_lea.hbm %s1039_s29, 1024  ;;  %s791_s11 = scalar_lea.hbm %s1089_s4, 2048 }
 0x19c   : > { %p788_p4 = scmp.ne.s32.totalorder %s1039_s29, %s787_s8  ;;  %p792_p9 = scmp.lt.s32.totalorder %s1039_s29, %s1089_s4 }
 0x19d   : > { %p793_p10 = scmp.lt.s32.totalorder %s791_s11, %s787_s8 }
 0x19e   : > { %p789_p7 = pnand %p788_p4, %p910_p5 }
 0x19f   : > { %p794_p11 = por %p793_p10, %p792_p9 }
 0x1a0   : > { %p790_p8 = pneg %p789_p7 }
 0x1a2   : > { %p795_p12 = pnand %p794_p11, %p790_p8 }
 0x1a4   : > { %798 = shalt.err (!%p795_p12)
}
 0x1a5   : > { %s845_s14 = smov 128   ;;  %s846_s20 = smov 8  }
 0x1a6   : > { %713 = dma.vmem_to_hbm [thread:$0]  (%p910_p5), %s1041_s23, 1024, %s1039_s29, %s1045_s19, %s845_s14, %s845_s14, %s846_s20  }
 0x1a7 PF: > { %p719_p13 = scmp.ge.s32.totalorder %s833_s18, 2  ;;  %s603_s22 = sand.u32 1, %s821_s15  }
 0x1a8   : > { %s604_s27 = scalar_lea.sflag [#allocation3], %s603_s22 }
 0x1a9   : > { %p716_p0 = pnand %p719_p13, %p914_p6 }
 0x1ab   : > { %p717_p1 = pneg %p716_p0 }
 0x1ad   : > { %816 = dma.done.wait (%p717_p1), %s604_s27, 1024  }
 0x1ae   : > { %818 = vsyncadd (%p717_p1), %s604_s27, 4294966272  ;;  %p14_p2 = scmp.ge.s32.totalorder %s897_s21, 4   ;;  %s1092_s15 = smov %s825_s16 }
 0x1af   : > { %s1093_s16 = smov %s829_s17  ;;  %s1094_s17 = smov %s908_s24 }
 0x1b0   : > { %s1095_s18 = smov %s897_s21  ;;  %16 = sbr.rel (!%p14_p2) target bundleno = 3 (0x3), region = 73 }
 0x1b5   :  { %609 = vsyncpa [#allocation3], 1 }
 0x1b6   :  { %611 = vsyncpa [#allocation3 + $0x1], 1 }

</bundles_post_ra>
